<compile_context>
chip_gen: v5e
topology: v5e:2x2
jax: 0.10.0
libtpu: 0.0.40
codegen_flags: <defaults>
</compile_context>

<pallas_src>
import functools

import numpy as np
import jax
import jax.numpy as jnp
from jax.experimental import pallas as pl
from jax.experimental.pallas import tpu as pltpu


def _round_up(x, m):
    return ((x + m - 1) // m) * m


# -----------------------------------------------------------------------------
# Constant +/-1 pair-difference matrix (built host-side at trace time).
# (z1 - z2) == D @ feat  for the torch pair construction; we return D.T.
# -----------------------------------------------------------------------------
def _pair_diff_matrix_T(num_class, num_size):
    C, S = num_class, num_size
    M = C * S
    half = S // 2
    idx1, idx2 = [], []
    # positive pairs: x1 = x[:, :S//2] paired with x2 = x[:, S//2:]
    for c in range(C):
        for j in range(half):
            idx1.append(c * S + j)
            idx2.append(c * S + half + j)
    # negative pairs: y1 = x[:C//2] paired with y2 = x[C//2:]
    for c in range(C // 2):
        for s in range(S):
            idx1.append(c * S + s)
            idx2.append((c + C // 2) * S + s)
    n_pairs = len(idx1)
    D = np.zeros((n_pairs, M), np.float32)
    D[np.arange(n_pairs), idx1] += 1.0
    D[np.arange(n_pairs), idx2] -= 1.0
    return D.T  # (M, n_pairs)


# -----------------------------------------------------------------------------
# Pallas kernel: pair diff -> squared distance -> Linear(H,1) -> sigmoid -> BCE
# plus all downstream scalar reductions.  Shapes are padded; `n_pairs` masks
# the padding out of the reductions.
# -----------------------------------------------------------------------------
def _siamese_kernel(ft_ref, dt_ref, w_ref, b_ref, out_ref, scal_ref, *,
                    n_pos, n_pairs, threshold):
    # ft: (Hp, Mp) f32 = feat^T (zero-padded)   hidden on sublanes, samples on lanes
    # dt: (Mp, Np) f32 = pair-diff^T (zero-padded)
    # w : (Hp, 1)  f32 = fc weight column (zero-padded)
    # b : (1,)     f32 in SMEM
    # out : (2, Np) f32 VMEM -> row 0 = score, row 1 = pred (lane-dense, fused)
    # scal: (4,)    f32 SMEM -> [mean_loss, correct, tp, pred_pos]
    diff_t = jnp.dot(ft_ref[...], dt_ref[...],
                     preferred_element_type=jnp.float32)        # (Hp, Np) = (z1-z2)^T
    dis_t = diff_t * diff_t
    # TODO(synk): nn.Dropout(0.5) on `dis` applies in training mode only;
    # eval-mode (identity) semantics are used here for determinism.

    # Linear(H, 1): VPU multiply + cross-sublane reduce (no 1-column MXU matvec).
    logit = jnp.sum(dis_t * w_ref[...], axis=0, keepdims=True) + b_ref[0]  # (1, Np)
    score = jax.nn.sigmoid(logit)                                          # (1, Np)

    # Labels/valid masks are static: first n_pos pairs are positive, lanes
    # beyond n_pairs are padding (no label/mask input needed).
    lane = jax.lax.broadcasted_iota(jnp.int32, logit.shape, 1)
    y = (lane < n_pos).astype(jnp.float32)
    valid = (lane < n_pairs).astype(jnp.float32)

    # BCE straight from the logit via log-sigmoid (one shared softplus),
    # keeping torch BCELoss's -100 clamp on the log terms.
    sp = jnp.log(1.0 + jnp.exp(-jnp.abs(logit)))                  # softplus(-|x|)
    log_p = jnp.maximum(jnp.minimum(logit, 0.0) - sp, -100.0)     # log(sigmoid(x))
    log_1mp = jnp.maximum(jnp.minimum(-logit, 0.0) - sp, -100.0)  # log(1-sigmoid(x))
    loss = -(y * log_p + (1.0 - y) * log_1mp) * valid             # (1, Np)

    pred = (score > threshold).astype(jnp.float32)                # (1, Np)

    # Fused lane-dense output (Np is a multiple of 128 -> unmasked stores).
    out_ref[0:1, :] = score
    out_ref[1:2, :] = pred

    # In-kernel scalar reductions (avoid tiny XLA ops / host round-trips).
    scal_ref[0] = jnp.sum(loss) * (1.0 / n_pairs)                       # mean loss
    scal_ref[1] = jnp.sum((pred == y).astype(jnp.float32) * valid)      # correct count
    scal_ref[2] = jnp.sum(pred * y)                                     # true positives
    scal_ref[3] = jnp.sum(pred * valid)                                 # predicted positives


def siamese_pair_call(featT, DT, w_col, b_vec, n_pos, n_pairs, threshold):
    Hp, Mp = featT.shape
    Np = DT.shape[1]
    kernel = functools.partial(_siamese_kernel, n_pos=n_pos, n_pairs=n_pairs,
                               threshold=threshold)
    out, scal = pl.pallas_call(
        kernel,
        out_shape=(
            jax.ShapeDtypeStruct((2, Np), jnp.float32),
            jax.ShapeDtypeStruct((4,), jnp.float32),
        ),
        grid=(1,),
        in_specs=[
            pl.BlockSpec((Hp, Mp), lambda i: (0, 0)),
            pl.BlockSpec((Mp, Np), lambda i: (0, 0)),
            pl.BlockSpec((Hp, 1), lambda i: (0, 0)),
            pl.BlockSpec(memory_space=pltpu.MemorySpace.SMEM),   # bias scalar
        ],
        out_specs=(
            pl.BlockSpec((2, Np), lambda i: (0, 0)),
            pl.BlockSpec(memory_space=pltpu.MemorySpace.SMEM),   # scalar stats
        ),
        compiler_params=pltpu.CompilerParams(
            dimension_semantics=("arbitrary",)),
    )(featT, DT, w_col, b_vec)
    return out, scal


# -----------------------------------------------------------------------------
# Siamese.forward wrapper (thin JAX glue, fully on-device, jitted)
# -----------------------------------------------------------------------------
@functools.partial(jax.jit, static_argnums=(3, 4, 5, 6))
def siamese_forward(feat, fc_w, fc_b, num_size, num_class, hidden_size,
                    threshold=0.5):
    # feat: (num_class * num_size, hidden_size) -- sentence_encoder output.
    n_pos = num_class * (num_size // 2)
    n_neg = (num_class // 2) * num_size
    n_pairs = n_pos + n_neg
    M = num_class * num_size

    # Hardware-friendly padded sizes (all static at trace time).
    Hp = _round_up(hidden_size, 8)     # sublane multiple
    Mp = _round_up(M, 128)             # lane multiple (contraction dim)
    Np = _round_up(n_pairs, 128)       # lane multiple (pair dim, lane-dense out)

    # Constant, zero-padded pair-difference matrix D^T.
    DT_np = np.zeros((Mp, Np), np.float32)
    DT_np[:M, :n_pairs] = _pair_diff_matrix_T(num_class, num_size)
    DT = jnp.asarray(DT_np)

    # Zero-padded feat^T / weight column; padding contributes exactly 0.
    featT = jnp.zeros((Hp, Mp), jnp.float32)
    featT = featT.at[:hidden_size, :M].set(feat.astype(jnp.float32).T)
    w_col = jnp.zeros((Hp, 1), jnp.float32)
    w_col = w_col.at[:hidden_size, 0].set(
        fc_w.astype(jnp.float32).reshape(hidden_size))
    b_vec = fc_b.astype(jnp.float32).reshape(1,)

    out, scal = siamese_pair_call(featT, DT, w_col, b_vec,
                                  n_pos, n_pairs, threshold)

    score = out[0, :n_pairs]
    pred = out[1, :n_pairs].astype(jnp.int32)
    label = (jnp.arange(n_pairs) < n_pos).astype(jnp.int32)

    loss = scal[0]
    accuracy = scal[1] / float(n_pairs)
    tp = scal[2]
    prec = tp / (scal[3] + 1.0)            # same "+1" smoothing as the original
    recall = tp / (float(n_pos) + 1.0)

    return {
        "score": score,
        "loss": loss,
        "accuracy": accuracy,
        "prec": prec,
        "recall": recall,
        "pred": pred,
        "label": label,
    }


if __name__ == "__main__":
    # Small, deterministic configuration.
    num_class = 4
    num_size = 8
    hidden_size = 32
    in_dim = 16
    threshold = 0.5

    key = jax.random.PRNGKey(0)
    k_data, k_enc, k_w, k_b = jax.random.split(key, 4)

    # Synthetic "sentence encoder": the real encoder is an external module; we
    # mimic it with a deterministic linear projection (plain-JAX glue).
    data = jax.random.normal(k_data, (num_class * num_size, in_dim),
                             dtype=jnp.float32)
    enc_w = jax.random.normal(k_enc, (in_dim, hidden_size),
                              dtype=jnp.float32) * 0.1
    feat = data @ enc_w                                  # (32, 32)

    # nn.Linear(hidden_size, 1) parameters, deterministic init.
    bound = float(1.0 / np.sqrt(hidden_size))
    fc_w = jax.random.uniform(k_w, (1, hidden_size), jnp.float32,
                              minval=-bound, maxval=bound)
    fc_b = jax.random.uniform(k_b, (1,), jnp.float32,
                              minval=-bound, maxval=bound)

    out = siamese_forward(feat, fc_w, fc_b, num_size, num_class,
                          hidden_size, threshold)
    jax.block_until_ready(out)

    # Pure-JAX reference of the original (torch-style) pair construction.
    x = feat.reshape(num_class, num_size, hidden_size)
    x1 = x[:, : num_size // 2].reshape(-1, hidden_size)
    x2 = x[:, num_size // 2:].reshape(-1, hidden_size)
    y1 = x[: num_class // 2].reshape(-1, hidden_size)
    y2 = x[num_class // 2:].reshape(-1, hidden_size)
    z1 = jnp.concatenate([x1, y1], 0)
    z2 = jnp.concatenate([x2, y2], 0)
    dis = (z1 - z2) ** 2
    ref_score = jax.nn.sigmoid(dis @ fc_w.T + fc_b)[:, 0]
    n_pos = x1.shape[0]
    n_pairs = ref_score.shape[0]
    ref_label = (jnp.arange(n_pairs) < n_pos).astype(jnp.float32)
    log_p = jnp.maximum(jnp.log(ref_score), -100.0)
    log_1mp = jnp.maximum(jnp.log(1.0 - ref_score), -100.0)
    ref_loss = jnp.mean(-(ref_label * log_p + (1.0 - ref_label) * log_1mp))
    ref_pred = (ref_score > threshold).astype(jnp.int32)
    ref_acc = jnp.mean((ref_pred == ref_label.astype(jnp.int32))
                       .astype(jnp.float32))

    np.testing.assert_allclose(np.asarray(out["score"]), np.asarray(ref_score),
                               rtol=2e-3, atol=2e-3)
    np.testing.assert_allclose(float(out["loss"]), float(ref_loss),
                               rtol=2e-3, atol=2e-3)
    np.testing.assert_array_equal(np.asarray(out["pred"]), np.asarray(ref_pred))
    np.testing.assert_allclose(float(out["accuracy"]), float(ref_acc),
                               rtol=1e-5, atol=1e-5)

    print("KERNEL_OK")
</pallas_src>

<mosaic_0001>
module attributes {stable_mosaic.version = 11 : i64} {
  func.func @_siamese_kernel(%arg0: i32, %arg1: memref<32x128xf32, #tpu.memory_space<vmem>>, %arg2: memref<128x128xf32, #tpu.memory_space<vmem>>, %arg3: memref<32x1xf32, #tpu.memory_space<vmem>>, %arg4: memref<1xf32, #tpu.memory_space<smem>>, %arg5: memref<2x128xf32, #tpu.memory_space<vmem>>, %arg6: memref<4xf32, #tpu.memory_space<smem>>) attributes {dimension_semantics = [#tpu.dimension_semantics<arbitrary>], iteration_bounds = array<i64: 1>, scalar_prefetch = 0 : i64, scratch_operands = 0 : i64, tpu.core_type = #tpu.core_type<tc>, window_params = [{pipeline_mode = #tpu.pipeline_mode<synchronous>, transform_indices = @transform_0, window_bounds = array<i64: 32, 128>}, {pipeline_mode = #tpu.pipeline_mode<synchronous>, transform_indices = @transform_1, window_bounds = array<i64: 128, 128>}, {pipeline_mode = #tpu.pipeline_mode<synchronous>, transform_indices = @transform_2, window_bounds = array<i64: 32, 1>}, {transform_indices = @transform_3, window_bounds = array<i64: 1>}, {pipeline_mode = #tpu.pipeline_mode<synchronous>, transform_indices = @transform_4, window_bounds = array<i64: 2, 128>}, {transform_indices = @transform_5, window_bounds = array<i64: 4>}]} {
    %c0 = arith.constant 0 : index
    %c0_0 = arith.constant 0 : index
    %0 = vector.load %arg1[%c0, %c0_0] : memref<32x128xf32, #tpu.memory_space<vmem>>, vector<32x128xf32>
    %c0_1 = arith.constant 0 : index
    %c0_2 = arith.constant 0 : index
    %1 = vector.load %arg2[%c0_1, %c0_2] : memref<128x128xf32, #tpu.memory_space<vmem>>, vector<128x128xf32>
    %cst = arith.constant dense<0.000000e+00> : vector<32x128xf32>
    %2 = tpu.matmul %0, %1, %cst {dimension_numbers = #tpu.dot_dimension_numbers<[1], [0], [0], [1], [0, 0, 1, 1], [], []>} : vector<32x128xf32>, vector<128x128xf32>, vector<32x128xf32> -> vector<32x128xf32>
    %3 = arith.mulf %2, %2 : vector<32x128xf32>
    %c0_3 = arith.constant 0 : index
    %c0_4 = arith.constant 0 : index
    %4 = vector.load %arg3[%c0_3, %c0_4] : memref<32x1xf32, #tpu.memory_space<vmem>>, vector<32x1xf32>
    %5 = vector.broadcast %4 : vector<32x1xf32> to vector<32x128xf32>
    %6 = arith.mulf %3, %5 : vector<32x128xf32>
    %cst_5 = arith.constant dense<0.000000e+00> : vector<128xf32>
    %7 = vector.multi_reduction <add>, %6, %cst_5 [0] : vector<32x128xf32> to vector<128xf32>
    %8 = vector.shape_cast %7 : vector<128xf32> to vector<1x128xf32>
    %c0_6 = arith.constant 0 : index
    %9 = memref.load %arg4[%c0_6] : memref<1xf32, #tpu.memory_space<smem>>
    %10 = vector.broadcast %9 : f32 to vector<1x128xf32>
    %11 = arith.addf %8, %10 : vector<1x128xf32>
    %12 = arith.negf %11 : vector<1x128xf32>
    %13 = math.exp %12 : vector<1x128xf32>
    %cst_7 = arith.constant 1.000000e+00 : f32
    %14 = vector.broadcast %cst_7 : f32 to vector<1x128xf32>
    %15 = arith.addf %14, %13 : vector<1x128xf32>
    %16 = arith.divf %14, %15 : vector<1x128xf32>
    %17 = tpu.iota {dimensions = array<i32: 1>} : vector<1x128xi32>
    %c16_i32 = arith.constant 16 : i32
    %18 = vector.broadcast %c16_i32 : i32 to vector<1x128xi32>
    %19 = arith.cmpi slt, %17, %18 : vector<1x128xi32>
    %20 = arith.extui %19 : vector<1x128xi1> to vector<1x128xi32>
    %21 = arith.sitofp %20 : vector<1x128xi32> to vector<1x128xf32>
    %c32_i32 = arith.constant 32 : i32
    %22 = vector.broadcast %c32_i32 : i32 to vector<1x128xi32>
    %23 = arith.cmpi slt, %17, %22 : vector<1x128xi32>
    %24 = arith.extui %23 : vector<1x128xi1> to vector<1x128xi32>
    %25 = arith.sitofp %24 : vector<1x128xi32> to vector<1x128xf32>
    %26 = math.absf %11 : vector<1x128xf32>
    %cst_8 = arith.constant 0.000000e+00 : f32
    %27 = vector.broadcast %cst_8 : f32 to vector<1x128xf32>
    %28 = arith.subf %27, %26 : vector<1x128xf32>
    %29 = math.exp %28 : vector<1x128xf32>
    %cst_9 = arith.constant 1.000000e+00 : f32
    %30 = vector.broadcast %cst_9 : f32 to vector<1x128xf32>
    %31 = arith.addf %30, %29 : vector<1x128xf32>
    %32 = math.log %31 : vector<1x128xf32>
    %cst_10 = arith.constant 0.000000e+00 : f32
    %33 = vector.broadcast %cst_10 : f32 to vector<1x128xf32>
    %34 = arith.minimumf %11, %33 : vector<1x128xf32>
    %35 = arith.subf %34, %32 : vector<1x128xf32>
    %cst_11 = arith.constant -1.000000e+02 : f32
    %36 = vector.broadcast %cst_11 : f32 to vector<1x128xf32>
    %37 = arith.maximumf %35, %36 : vector<1x128xf32>
    %cst_12 = arith.constant 0.000000e+00 : f32
    %38 = vector.broadcast %cst_12 : f32 to vector<1x128xf32>
    %39 = arith.subf %38, %11 : vector<1x128xf32>
    %cst_13 = arith.constant 0.000000e+00 : f32
    %40 = vector.broadcast %cst_13 : f32 to vector<1x128xf32>
    %41 = arith.minimumf %39, %40 : vector<1x128xf32>
    %42 = arith.subf %41, %32 : vector<1x128xf32>
    %cst_14 = arith.constant -1.000000e+02 : f32
    %43 = vector.broadcast %cst_14 : f32 to vector<1x128xf32>
    %44 = arith.maximumf %42, %43 : vector<1x128xf32>
    %45 = arith.mulf %21, %37 : vector<1x128xf32>
    %cst_15 = arith.constant 1.000000e+00 : f32
    %46 = vector.broadcast %cst_15 : f32 to vector<1x128xf32>
    %47 = arith.subf %46, %21 : vector<1x128xf32>
    %48 = arith.mulf %47, %44 : vector<1x128xf32>
    %49 = arith.addf %45, %48 : vector<1x128xf32>
    %cst_16 = arith.constant 0.000000e+00 : f32
    %50 = vector.broadcast %cst_16 : f32 to vector<1x128xf32>
    %51 = arith.subf %50, %49 : vector<1x128xf32>
    %52 = arith.mulf %51, %25 : vector<1x128xf32>
    %cst_17 = arith.constant 5.000000e-01 : f32
    %53 = vector.broadcast %cst_17 : f32 to vector<1x128xf32>
    %54 = arith.cmpf ogt, %16, %53 : vector<1x128xf32>
    %55 = arith.extui %54 : vector<1x128xi1> to vector<1x128xi32>
    %56 = arith.sitofp %55 : vector<1x128xi32> to vector<1x128xf32>
    %c0_18 = arith.constant 0 : index
    %c0_19 = arith.constant 0 : index
    %57 = vector.load %arg5[%c0_18, %c0_19] : memref<2x128xf32, #tpu.memory_space<vmem>>, vector<1x128xf32>
    tpu.vector_store %arg5[%c0_18, %c0_19], %16 {strides = array<i32>} : memref<2x128xf32, #tpu.memory_space<vmem>>, vector<1x128xf32>,
    %c1 = arith.constant 1 : index
    %c0_20 = arith.constant 0 : index
    %58 = vector.load %arg5[%c1, %c0_20] : memref<2x128xf32, #tpu.memory_space<vmem>>, vector<1x128xf32>
    tpu.vector_store %arg5[%c1, %c0_20], %56 {strides = array<i32>} : memref<2x128xf32, #tpu.memory_space<vmem>>, vector<1x128xf32>,
    %59 = vector.shape_cast %52 : vector<1x128xf32> to vector<1x1x128xf32>
    %cst_21 = arith.constant dense<0.000000e+00> : vector<1xf32>
    %60 = vector.multi_reduction <add>, %59, %cst_21 [1, 2] : vector<1x1x128xf32> to vector<1xf32>
    %61 = vector.shape_cast %60 : vector<1xf32> to vector<1x1x1xf32>
    %62 = vector.extract %61[0, 0, 0] : f32 from vector<1x1x1xf32>
    %cst_22 = arith.constant 3.125000e-02 : f32
    %63 = arith.mulf %62, %cst_22 : f32
    %c0_23 = arith.constant 0 : index
    %64 = memref.load %arg6[%c0_23] : memref<4xf32, #tpu.memory_space<smem>>
    memref.store %63, %arg6[%c0_23] : memref<4xf32, #tpu.memory_space<smem>>
    %65 = arith.cmpf oeq, %56, %21 : vector<1x128xf32>
    %66 = arith.extui %65 : vector<1x128xi1> to vector<1x128xi32>
    %67 = arith.sitofp %66 : vector<1x128xi32> to vector<1x128xf32>
    %68 = arith.mulf %67, %25 : vector<1x128xf32>
    %69 = vector.shape_cast %68 : vector<1x128xf32> to vector<1x1x128xf32>
    %cst_24 = arith.constant dense<0.000000e+00> : vector<1xf32>
    %70 = vector.multi_reduction <add>, %69, %cst_24 [1, 2] : vector<1x1x128xf32> to vector<1xf32>
    %71 = vector.shape_cast %70 : vector<1xf32> to vector<1x1x1xf32>
    %72 = vector.extract %71[0, 0, 0] : f32 from vector<1x1x1xf32>
    %c1_25 = arith.constant 1 : index
    %73 = memref.load %arg6[%c1_25] : memref<4xf32, #tpu.memory_space<smem>>
    memref.store %72, %arg6[%c1_25] : memref<4xf32, #tpu.memory_space<smem>>
    %74 = arith.mulf %56, %21 : vector<1x128xf32>
    %75 = vector.shape_cast %74 : vector<1x128xf32> to vector<1x1x128xf32>
    %cst_26 = arith.constant dense<0.000000e+00> : vector<1xf32>
    %76 = vector.multi_reduction <add>, %75, %cst_26 [1, 2] : vector<1x1x128xf32> to vector<1xf32>
    %77 = vector.shape_cast %76 : vector<1xf32> to vector<1x1x1xf32>
    %78 = vector.extract %77[0, 0, 0] : f32 from vector<1x1x1xf32>
    %c2 = arith.constant 2 : index
    %79 = memref.load %arg6[%c2] : memref<4xf32, #tpu.memory_space<smem>>
    memref.store %78, %arg6[%c2] : memref<4xf32, #tpu.memory_space<smem>>
    %80 = arith.mulf %56, %25 : vector<1x128xf32>
    %81 = vector.shape_cast %80 : vector<1x128xf32> to vector<1x1x128xf32>
    %cst_27 = arith.constant dense<0.000000e+00> : vector<1xf32>
    %82 = vector.multi_reduction <add>, %81, %cst_27 [1, 2] : vector<1x1x128xf32> to vector<1xf32>
    %83 = vector.shape_cast %82 : vector<1xf32> to vector<1x1x1xf32>
    %84 = vector.extract %83[0, 0, 0] : f32 from vector<1x1x1xf32>
    %c3 = arith.constant 3 : index
    %85 = memref.load %arg6[%c3] : memref<4xf32, #tpu.memory_space<smem>>
    memref.store %84, %arg6[%c3] : memref<4xf32, #tpu.memory_space<smem>>
    return
  }
  func.func @transform_0(%arg0: i32) -> (i32, i32) {
    %c0_i32 = arith.constant 0 : i32
    %c0_i32_0 = arith.constant 0 : i32
    %c0_i32_1 = arith.constant 0 : i32
    return %c0_i32, %c0_i32_0 : i32, i32
  }
  func.func @transform_1(%arg0: i32) -> (i32, i32) {
    %c0_i32 = arith.constant 0 : i32
    %c0_i32_0 = arith.constant 0 : i32
    %c0_i32_1 = arith.constant 0 : i32
    return %c0_i32, %c0_i32_0 : i32, i32
  }
  func.func @transform_2(%arg0: i32) -> (i32, i32) {
    %c0_i32 = arith.constant 0 : i32
    %c0_i32_0 = arith.constant 0 : i32
    %c0_i32_1 = arith.constant 0 : i32
    return %c0_i32, %c0_i32_0 : i32, i32
  }
  func.func @transform_3(%arg0: i32) -> i32 {
    %c0_i32 = arith.constant 0 : i32
    %c0_i32_0 = arith.constant 0 : i32
    return %c0_i32 : i32
  }
  func.func @transform_4(%arg0: i32) -> (i32, i32) {
    %c0_i32 = arith.constant 0 : i32
    %c0_i32_0 = arith.constant 0 : i32
    %c0_i32_1 = arith.constant 0 : i32
    return %c0_i32, %c0_i32_0 : i32, i32
  }
  func.func @transform_5(%arg0: i32) -> i32 {
    %c0_i32 = arith.constant 0 : i32
    %c0_i32_0 = arith.constant 0 : i32
    return %c0_i32 : i32
  }
}

</mosaic_0001>

<bundles_post_ra>
// kernel: siamese_forward.1
= control target key start
LH: loop header
LB: loop body
LE: loop exit
PB: predicated region body
PF: predicated region fallthrough
CT: control target
= control target key end

     0   :  { %s450_s0 = inlined_call_operand.vmem [shape: f32[32,128], index: 0, kind: input, shape index: {}]   ;;  %s451_s1 = inlined_call_operand.vmem [shape: f32[128,128], index: 1, kind: input, shape index: {}]   ;;  %s452_s2 = inlined_call_operand.vmem [shape: f32[32,1], index: 2, kind: input, shape index: {}]   ;;  %s453_s3 = inlined_call_operand.<no memory space> [shape: f32[1], index: 3, kind: input, shape index: {}]   ;;  %s454_s4 = inlined_call_operand.vmem [shape: f32[2,128], index: 4, kind: output, shape index: {0}]   ;;  %s455_s5 = inlined_call_operand.vmem [shape: f32[4], index: 5, kind: output, shape index: {1}]  }
   0x1   :  { %v40_v0 = vld [vmem:[%s451_s1 + $0x78] sm:$0xff]  ;;  %v39_v1 = vld [vmem:[%s451_s1 + $0x70] sm:$0xff]  ;;  %v38_v2 = vld [vmem:[%s451_s1 + $0x68] sm:$0xff] }
   0x2   :  { %41 = vmatpush.msra.mxu0 %v40_v0  ;;  %246 = vmatpush.msra.mxu1 %v40_v0  ;;  %v37_v3 = vld [vmem:[%s451_s1 + $0x60] sm:$0xff]  ;;  %v36_v4 = vld [vmem:[%s451_s1 + $0x58] sm:$0xff] }
   0x3   :  { %247 = vmatpush.msra.mxu2 %v40_v0  ;;  %248 = vmatpush.msra.mxu3 %v40_v0 }
   0x4   :  { %42 = vmatpush.msra.mxu0 %v39_v1  ;;  %249 = vmatpush.msra.mxu1 %v39_v1 }
   0x5   :  { %250 = vmatpush.msra.mxu2 %v39_v1  ;;  %251 = vmatpush.msra.mxu3 %v39_v1 }
   0x6   :  { %43 = vmatpush.msra.mxu0 %v38_v2  ;;  %252 = vmatpush.msra.mxu1 %v38_v2 }
   0x7   :  { %253 = vmatpush.msra.mxu2 %v38_v2  ;;  %254 = vmatpush.msra.mxu3 %v38_v2 }
   0x8   :  { %44 = vmatpush.msra.mxu0 %v37_v3  ;;  %255 = vmatpush.msra.mxu1 %v37_v3 }
   0x9   :  { %12 = vsyncpa [#allocation4], 0  ;;  %256 = vmatpush.msra.mxu2 %v37_v3  ;;  %257 = vmatpush.msra.mxu3 %v37_v3  ;;  %v35_v5 = vld [vmem:[%s451_s1 + $0x50] sm:$0xff]  ;;  %v34_v6 = vld [vmem:[%s451_s1 + $0x48] sm:$0xff]  ;;  %v329_v21 = vmov 0   ;;  %v112_v49 = vstv %s453_s3  ;;  %v133_v58 = vlaneseq  ;;  %v330_v2 = vmov 0.0  }
   0xa   :  { %45 = vmatpush.msra.mxu0 %v36_v4  ;;  %258 = vmatpush.msra.mxu1 %v36_v4  ;;  %v33_v7 = vld [vmem:[%s451_s1 + $0x40] sm:$0xff]  ;;  %v32_v8 = vld [vmem:[%s451_s1 + $0x38] sm:$0xff]  ;;  %v31_v9 = vld [vmem:[%s451_s1 + $0x30] sm:$0xff]  ;;  %vm166_vm7 = vcmask 1040384   ;;  %s229_s21 = sshll.u32 %s455_s5, 4  ;;  %s331_s25 = smov [#allocation3]   ;;  %s230_s21 = int_to_ptr.vmem [resolvable:$true] %s229_s21 }
   0xb   :  { %259 = vmatpush.msra.mxu2 %v36_v4  ;;  %260 = vmatpush.msra.mxu3 %v36_v4  ;;  %v30_v10 = vld [vmem:[%s451_s1 + $0x28] sm:$0xff]  ;;  %v29_v11 = vld [vmem:[%s451_s1 + $0x20] sm:$0xff]  ;;  %v28_v12 = vld [vmem:[%s451_s1 + $0x18] sm:$0xff]  ;;  %v134_v60 = vand.u32 127, %v133_v58 }
   0xc   :  { %46 = vmatpush.msra.mxu0 %v35_v5  ;;  %261 = vmatpush.msra.mxu1 %v35_v5  ;;  %v27_v13 = vld [vmem:[%s451_s1 + $0x10] sm:$0xff]  ;;  %v26_v14 = vld [vmem:[%s451_s1 + $0x8] sm:$0xff]  ;;  %v25_v15 = vld [vmem:[%s451_s1] sm:$0xff] }
   0xd   :  { %262 = vmatpush.msra.mxu2 %v35_v5  ;;  %263 = vmatpush.msra.mxu3 %v35_v5  ;;  %v21_v16 = vld [vmem:[%s450_s0] sm:$0xff]  ;;  %v22_v17 = vld [vmem:[%s450_s0 + $0x8] sm:$0xff]  ;;  %v23_v18 = vld [vmem:[%s450_s0 + $0x10] sm:$0xff]  ;;  %vm135_vm0 = vcmp.lt.s32.totalorder %v134_v60, 16  ;;  %vm138_vm2 = vcmp.lt.s32.totalorder %v134_v60, 32 }
   0xe   :  { %47 = vmatpush.msra.mxu0 %v34_v6  ;;  %264 = vmatpush.msra.mxu1 %v34_v6  ;;  %v24_v19 = vld [vmem:[%s450_s0 + $0x18] sm:$0xff]  ;;  %v74_v20 = vld [vmem:[%s452_s2] sm:$0xff]  ;;  %v76_v22 = vld [vmem:[%s452_s2 + $0x10] sm:$0xff]  ;;  %v242_v3 = vsel %vm135_vm0, 1.0, %v330_v2 }
   0xf   :  { %265 = vmatpush.msra.mxu2 %v34_v6  ;;  %266 = vmatpush.msra.mxu3 %v34_v6  ;;  %v75_v23 = vld [vmem:[%s452_s2 + $0x8] sm:$0xff]  ;;  %v77_v24 = vld [vmem:[%s452_s2 + $0x18] sm:$0xff] }
  0x10   :  { %48 = vmatpush.msra.mxu0 %v33_v7  ;;  %267 = vmatpush.msra.mxu1 %v33_v7 }
  0x11   :  { %268 = vmatpush.msra.mxu2 %v33_v7  ;;  %269 = vmatpush.msra.mxu3 %v33_v7 }
  0x12   :  { %49 = vmatpush.msra.mxu0 %v32_v8  ;;  %270 = vmatpush.msra.mxu1 %v32_v8 }
  0x13   :  { %271 = vmatpush.msra.mxu2 %v32_v8  ;;  %272 = vmatpush.msra.mxu3 %v32_v8 }
  0x14   :  { %50 = vmatpush.msra.mxu0 %v31_v9  ;;  %273 = vmatpush.msra.mxu1 %v31_v9 }
  0x15   :  { %274 = vmatpush.msra.mxu2 %v31_v9  ;;  %275 = vmatpush.msra.mxu3 %v31_v9 }
  0x16   :  { %51 = vmatpush.msra.mxu0 %v30_v10  ;;  %276 = vmatpush.msra.mxu1 %v30_v10 }
  0x17   :  { %277 = vmatpush.msra.mxu2 %v30_v10  ;;  %278 = vmatpush.msra.mxu3 %v30_v10 }
  0x18   :  { %52 = vmatpush.msra.mxu0 %v29_v11  ;;  %279 = vmatpush.msra.mxu1 %v29_v11 }
  0x19   :  { %280 = vmatpush.msra.mxu2 %v29_v11  ;;  %281 = vmatpush.msra.mxu3 %v29_v11  ;;  %v156_v11 = vsub.f32 1.0, %v242_v3 }
  0x1a   :  { %53 = vmatpush.msra.mxu0 %v28_v12  ;;  %282 = vmatpush.msra.mxu1 %v28_v12 }
  0x1b   :  { %283 = vmatpush.msra.mxu2 %v28_v12  ;;  %284 = vmatpush.msra.mxu3 %v28_v12 }
  0x1c   :  { %54 = vmatpush.msra.mxu0 %v27_v13  ;;  %285 = vmatpush.msra.mxu1 %v27_v13 }
  0x1d   :  { %286 = vmatpush.msra.mxu2 %v27_v13  ;;  %287 = vmatpush.msra.mxu3 %v27_v13 }
  0x1e   :  { %55 = vmatpush.msra.mxu0 %v26_v14  ;;  %288 = vmatpush.msra.mxu1 %v26_v14 }
  0x1f   :  { %289 = vmatpush.msra.mxu2 %v26_v14  ;;  %290 = vmatpush.msra.mxu3 %v26_v14 }
  0x20   :  { %56 = vmatpush.msra.mxu0 %v25_v15  ;;  %291 = vmatpush.msra.mxu1 %v25_v15 }
  0x21   :  { %292 = vmatpush.msra.mxu2 %v25_v15  ;;  %293 = vmatpush.msra.mxu3 %v25_v15 }
  0x22   :  { %305 = vset.pattern.permute.xlu0 %v329_v21  ;;  %57 = vmatmul.f32.vlgmr.msra.gmra.mxu0 %v21_v16 }
  0x23   :  { %60 = vmatmul.f32.vlgmr.msra.gmra.mxu1 %v22_v17  ;;  %63 = vmatmul.f32.vlgmr.msra.gmra.mxu2 %v23_v18 }
  0x24   :  { %66 = vmatmul.f32.vlgmr.msra.gmra.mxu3 %v24_v19  ;;  %80 = vperm.xlu0 %305, %v74_v20   ;;  %v243_v20 = vsel %vm138_vm2, 1.0, %v330_v2 }
  0x25   :  { %306 = vset.pattern.permute.xlu1 %v329_v21 }
  0x26   :  { %90 = vperm.xlu1 %306, %v76_v22  }
  0x2c   :  { %85 = vperm.xlu0 %305, %v75_v23  }
  0x2e   :  { %95 = vperm.xlu1 %306, %v77_v24  }
  0x96   :  { %v81_v25 = vpop.permute.xlu0 %80 }
  0x98   :  { %v91_v27 = vpop.permute.xlu1 %90 }
  0x9e   :  { %v86_v31 = vpop.permute.xlu0 %85 }
  0x9f   :  { %v58_v26 = vpop.f32.mrf.mxu0 }
  0xa0   :  { %v61_v28 = vpop.f32.mrf.mxu1  ;;  %v70_v29 = vmul.f32 %v58_v26, %v58_v26  ;;  %v96_v40 = vpop.permute.xlu1 %95 }
  0xa1   :  { %v71_v30 = vmul.f32 %v61_v28, %v61_v28 }
  0xa2   :  { %v98_v32 = vmul.f32 %v81_v25, %v70_v29 }
  0xa3   :  { %v99_v33 = vmul.f32 %v86_v31, %v71_v30 }
  0xa5   :  { %v102_v38 = vadd.f32 %v99_v33, %v98_v32 }
  0xa6   :  { %v64_v34 = vpop.f32.mrf.mxu2 }
  0xa7   :  { %v72_v35 = vmul.f32 %v64_v34, %v64_v34  ;;  %v67_v36 = vpop.f32.mrf.mxu3 }
  0xa8   :  { %v73_v37 = vmul.f32 %v67_v36, %v67_v36 }
  0xa9   :  { %v100_v39 = vmul.f32 %v91_v27, %v72_v35 }
  0xaa   :  { %v101_v42 = vmul.f32 %v96_v40, %v73_v37 }
  0xab   :  { %v103_v41 = vadd.f32 %v102_v38, %v100_v39 }
  0xad   :  { %v104_v43 = vadd.f32 %v103_v41, %v101_v42 }
  0xaf   :  { %v105_v44 = vrot.slane %v104_v43, 4 }
  0xb1   :  { %v106_v45 = vadd.f32 %v105_v44, %v104_v43 }
  0xb3   :  { %v107_v46 = vrot.slane %v106_v45, 2 }
  0xb5   :  { %v108_v47 = vadd.f32 %v107_v46, %v106_v45 }
  0xb7   :  { %v109_v48 = vrot.slane %v108_v47, 1 }
  0xb9   :  { %v110_v50 = vadd.f32 %v109_v48, %v108_v47 }
  0xbb   :  { %v113_v51 = vadd.f32 %v112_v49, %v110_v50 }
  0xbd   :  { %v241_v52 = vmul.f32 -1.442695, %v113_v51  ;;  %v141_v53 = vand.u32 2147483647, %v113_v51  ;;  %v151_v63 = vsub.f32 0.0, %v113_v51  ;;  %v148_v6 = vmin.f32 %v113_v51, 0.0 }
  0xbf   :  { %307 = vpow2.f32 %v241_v52  ;;  %v142_v54 = vsub.f32 0.0, %v141_v53  ;;  %v152_v7 = vmin.f32 %v151_v63, 0.0 }
  0xc1   :  { %v143_v55 = vmul.f32 1.442695, %v142_v54 }
  0xc3   :  { %309 = vpow2.f32 %v143_v55 }
  0xc5   :  { %v308_v56 = vpop.eup %307 }
  0xc6   :  { %v117_v57 = vadd.f32 1.0, %v308_v56 }
  0xc8   :  { %311 = vrcp.f32 %v117_v57  ;;  %v129_v5 = vand.u32 2147483648, %v117_v57  ;;  %v127_v9 = vand.u32 2147483647, %v117_v57  ;;  %vm123_vm3 = vweird.f32 %v117_v57 }
  0xc9   :  { %v310_v59 = vpop.eup %309 }
  0xca   :  { %v145_v61 = vadd.f32 1.0, %v310_v59  ;;  %v130_v15 = vor.u32 1.1754944e-38, %v129_v5  ;;  %vm128_vm5 = vcmp.eq.f32.partialorder %v127_v9, 8.507059e+37 }
  0xcc   :  { %313 = vlog2.f32 %v145_v61 }
  0xce   :  { %v312_v62 = vpop.eup %311 }
  0xcf   :  { %v119_v0 = vmul.f32 %v312_v62, %v117_v57  ;;  %vm124_vm1 = vweird.f32 %v312_v62 }
  0xd0   :  { %vm125_vm4 = vmor %vm123_vm3, %vm124_vm1 }
  0xd1   :  { %v120_v1 = vsub.f32 1.0, %v119_v0 }
  0xd2   :  { %v314_v4 = vpop.eup %313 }
  0xd3   :  { %v121_v8 = vmul.f32 %v312_v62, %v120_v1  ;;  %v147_v10 = vmul.f32 0.6931472, %v314_v4 }
  0xd5   :  { %v122_v12 = vadd.f32 %v312_v62, %v121_v8  ;;  %v149_v13 = vsub.f32 %v148_v6, %v147_v10  ;;  %v153_v14 = vsub.f32 %v152_v7, %v147_v10 }
  0xd7   :  { %v126_v16 = vsel %vm125_vm4, %v312_v62, %v122_v12  ;;  %v150_v17 = vmax.f32 %v149_v13, -100.0  ;;  %v154_v18 = vmax.f32 %v153_v14, -100.0 }
  0xd8   :  { %v131_v19 = vsel %vm128_vm5, %v130_v15, %v126_v16 }
  0xd9   :  { %vm161_vm6 = vcmp.gt.f32.partialorder %v131_v19, 0.5  ;;  %164 = vst [vmem:[%s454_s4] sm:$0x1] %v131_v19  ;;  %v155_v21 = vmul.f32 %v242_v3, %v150_v17  ;;  %v157_v22 = vmul.f32 %v156_v11, %v154_v18 }
  0xda   :  { %v244_v23 = vsel %vm161_vm6, 1.0, %v330_v2 }
  0xdb   :  { %v209_v24 = vmul.f32 %v244_v23, %v243_v20  ;;  %165 = vst [vmem:[%s454_s4 + $0x1] sm:$0x1] %v244_v23  ;;  %v196_v25 = vmul.f32 %v244_v23, %v242_v3  ;;  %v158_v26 = vadd.f32 %v157_v22, %v155_v21  ;;  %vm180_vm8 = vcmp.eq.f32.partialorder %v244_v23, %v242_v3 }
  0xdc   :  { %v245_v32 = vsel %vm180_vm8, 1.0, %v330_v2 }
  0xdd   :  { %v210_v27 = vsel %vm166_vm7, %v209_v24, 0.0  ;;  %v197_v28 = vsel %vm166_vm7, %v196_v25, 0.0  ;;  %v159_v29 = vsub.f32 0.0, %v158_v26  ;;  %v183_v33 = vmul.f32 %v245_v32, %v243_v20 }
  0xde   :  { %211 = vadd.xlane.f32.xlu1 %v210_v27  ;;  %198 = vadd.xlane.f32.xlu0 %v197_v28 }
  0xdf   :  { %v160_v30 = vmul.f32 %v243_v20, %v159_v29  ;;  %v184_v34 = vsel %vm166_vm7, %v183_v33, 0.0 }
  0xe1   :  { %v167_v31 = vsel %vm166_vm7, %v160_v30, 0.0 }
  0xe2   :  { %168 = vadd.xlane.f32.xlu2 %v167_v31 }
  0xea   :  { %185 = vadd.xlane.f32.xlu2 %v184_v34 }
 0x151   :  { %v199_v35 = vpop.xlane.xlu0 %198  ;;  %v212_v36 = vpop.xlane.xlu1 %211 }
 0x152   :  { %v200_v37 = vrot.slane %v199_v35, 4  ;;  %v213_v39 = vrot.slane %v212_v36, 4 }
 0x154   :  { %v201_v42 = vadd.f32 %v200_v37, %v199_v35  ;;  %v214_v43 = vadd.f32 %v213_v39, %v212_v36 }
 0x155   :  { %v169_v38 = vpop.xlane.xlu2 %168 }
 0x156   :  { %v170_v40 = vrot.slane %v169_v38, 4  ;;  %v202_v46 = vrot.slane %v201_v42, 2  ;;  %v215_v48 = vrot.slane %v214_v43, 2 }
 0x158   :  { %v171_v41 = vadd.f32 %v170_v40, %v169_v38  ;;  %v203_v53 = vadd.f32 %v202_v46, %v201_v42  ;;  %v216_v54 = vadd.f32 %v215_v48, %v214_v43 }
 0x15a   :  { %v172_v44 = vrot.slane %v171_v41, 2  ;;  %v204_v57 = vrot.slane %v203_v53, 1  ;;  %v217_v59 = vrot.slane %v216_v54, 1 }
 0x15c   :  { %v173_v45 = vadd.f32 %v172_v44, %v171_v41  ;;  %v205_v61 = vadd.f32 %v204_v57, %v203_v53  ;;  %v218_v62 = vadd.f32 %v217_v59, %v216_v54 }
 0x15d   :  { %v186_v47 = vpop.xlane.xlu2 %185 }
 0x15e   :  { %v187_v49 = vrot.slane %v186_v47, 4  ;;  %v174_v50 = vrot.slane %v173_v45, 1 }
 0x160   :  { %v188_v51 = vadd.f32 %v187_v49, %v186_v47  ;;  %v175_v52 = vadd.f32 %v174_v50, %v173_v45 }
 0x162   :  { %v189_v55 = vrot.slane %v188_v51, 2  ;;  %294 = vpush %v175_v52 }
 0x164   :  { %v190_v56 = vadd.f32 %v189_v55, %v188_v51 }
 0x166   :  { %v191_v58 = vrot.slane %v190_v56, 1 }
 0x168   :  { %v192_v60 = vadd.f32 %v191_v58, %v190_v56 }
 0x16a   :  { %296 = vpush %v192_v60 }
 0x16b   :  { %298 = vpush %v205_v61 }
 0x16c   :  { %300 = vpush %v218_v62 }
 0x193   :  { %s295_s4 = spop %294 }
 0x194   :  { %s177_s18 = smul.f32 0.03125, %s295_s4 }
 0x196   :  { %179 = sst [smem:[#allocation3]] %s177_s18 }
 0x19b   :  { %s297_s22 = spop %296 }
 0x19c   :  { %195 = sst [smem:[#allocation3 + $0x1]] %s297_s22  ;;  %s299_s23 = spop %298 }
 0x19d   :  { %208 = sst [smem:[#allocation3 + $0x2]] %s299_s23  ;;  %s301_s24 = spop %300 }
 0x19e   :  { %221 = sst [smem:[#allocation3 + $0x3]] %s301_s24 }
 0x19f   :  { %232 = dma.smem_to_vmem %s331_s25, 16, %s230_s21, [#allocation4]  }
 0x1a0   :  { %327 = dma.done.wait [#allocation4], 16  }
 0x1a1   :  { %328 = vsyncadd [#allocation4], 4294967280 }
 0x1a2   :  { %239 = sfence }
 0x1a3   :  { %240 = vsyncpa [#allocation4], 1 }

</bundles_post_ra>
